<compile_context>
chip_gen: v5e
topology: v5e:2x2
jax: 0.10.0
libtpu: 0.0.40
codegen_flags: <defaults>
</compile_context>

<pallas_src>
import jax
import jax.numpy as jnp
from jax.experimental import pallas as pl
from jax.experimental.pallas import tpu as pltpu

_LANE = 128
_TARGET_BLOCK_BYTES = 2 * 1024 * 1024   # ~2 MiB per block buffer
_MAX_WIDTH = 4096                        # lane-dim cap (elements)


def _copy_kernel(x_ref, o_ref):
    # Straight tile copy (identity on the flattened element stream).
    o_ref[...] = x_ref[...]


def _tiled_copy_2d(mat):
    """Copy a 2-D (rows, width) array through VMEM with a tiled Pallas kernel."""
    rows, width = mat.shape
    itemsize = mat.dtype.itemsize
    # Minimum sublane tile for the packed dtype: 8 (f32), 16 (bf16), 32 (int8).
    sublane_min = max(8, 32 // itemsize)

    # Aim for ~_TARGET_BLOCK_BYTES per block, rounded to the sublane minimum.
    rows_for_target = max(1, _TARGET_BLOCK_BYTES // (width * itemsize))
    block_rows = (rows_for_target // sublane_min) * sublane_min
    if block_rows == 0:
        block_rows = sublane_min
    if block_rows >= rows:
        block_rows = rows            # full-extent block is always legal

    grid = pl.cdiv(rows, block_rows)
    n_bytes = rows * width * itemsize

    return pl.pallas_call(
        _copy_kernel,
        out_shape=jax.ShapeDtypeStruct((rows, width), mat.dtype),
        grid_spec=pltpu.PrefetchScalarGridSpec(
            num_scalar_prefetch=0,
            grid=(grid,),
            in_specs=[pl.BlockSpec((block_rows, width), lambda i: (i, 0))],
            out_specs=pl.BlockSpec((block_rows, width), lambda i: (i, 0)),
        ),
        compiler_params=pltpu.CompilerParams(
            dimension_semantics=("parallel",),
        ),
        cost_estimate=pl.CostEstimate(
            flops=0, transcendentals=0, bytes_accessed=2 * n_bytes),
    )(mat)


def _pallas_flat_copy(flat):
    """Copy a 1-D array through a Pallas kernel with lane-dense, MB-scale tiles."""
    n = flat.shape[0]
    if n == 0:
        return flat
    itemsize = flat.dtype.itemsize
    sublane_min = max(8, 32 // itemsize)

    if n % _LANE == 0:
        # Common NN case: no padding, no post-slice -> exactly 1 HBM read + 1 write.
        total_lanes = n // _LANE
        max_k = _MAX_WIDTH // _LANE
        k = 1
        for cand in range(min(max_k, total_lanes), 0, -1):
            if total_lanes % cand == 0:
                k = cand
                break
        width = k * _LANE
        rows = n // width
        out = _tiled_copy_2d(flat.reshape(rows, width))
        return out.reshape(n)

    # Ragged fallback (size not a multiple of 128): pad, copy, slice the tail.
    tile = sublane_min * _LANE
    n_pad = pl.cdiv(n, tile) * tile
    padded = jnp.pad(flat, (0, n_pad - n))
    out = _tiled_copy_2d(padded.reshape(n_pad // _LANE, _LANE))
    return out.reshape(-1)[:n]


def reshape_forward(x, shape):
    """Pallas-backed equivalent of torch.Tensor.view(shape) on a contiguous tensor."""
    shape = tuple(int(s) for s in shape)
    # Resolve a single -1 dimension, mirroring torch.view semantics.
    if -1 in shape:
        assert shape.count(-1) == 1, "view(): only one dimension can be inferred"
        known = 1
        for s in shape:
            if s != -1:
                known *= s
        assert known > 0 and x.size % known == 0, \
            "view(): shape is invalid for input size"
        shape = tuple(x.size // known if s == -1 else s for s in shape)
    total = 1
    for s in shape:
        total *= s
    assert total == x.size, "view(): shape is invalid for input size"

    flat = x.reshape(-1)                 # metadata only (row-major, like torch)
    copied = _pallas_flat_copy(flat)     # data path through the Pallas kernel
    return copied.reshape(shape)         # metadata only


if __name__ == "__main__":
    key = jax.random.PRNGKey(0)

    # NCHW activation flattened for a linear layer, i.e. Reshape(-1, C*H*W).
    x = jax.random.normal(key, (2, 4, 16, 16), dtype=jnp.float32)
    target_shape = (-1, 4 * 16 * 16)     # Reshape(-1, 1024)
    y = reshape_forward(x, target_shape)
    jax.block_until_ready(y)

    expected = x.reshape(2, 1024)
    assert y.shape == (2, 1024), y.shape
    assert y.dtype == x.dtype
    assert bool(jnp.array_equal(y, expected))

    # Ragged-size fallback path (element count not a multiple of 128).
    x2 = jax.random.normal(key, (3, 5, 7), dtype=jnp.float32)
    y2 = reshape_forward(x2, (-1,))
    jax.block_until_ready(y2)
    assert y2.shape == (105,)
    assert bool(jnp.array_equal(y2, x2.reshape(-1)))

    print("KERNEL_OK")
</pallas_src>

<mosaic_0001>
module attributes {stable_mosaic.version = 11 : i64} {
  func.func @_copy_kernel(%arg0: i32, %arg1: memref<1x2048xf32, #tpu.memory_space<vmem>>, %arg2: memref<1x2048xf32, #tpu.memory_space<vmem>>) attributes {dimension_semantics = [#tpu.dimension_semantics<parallel>], iteration_bounds = array<i64: 1>, scalar_prefetch = 0 : i64, scratch_operands = 0 : i64, tpu.core_type = #tpu.core_type<tc>, window_params = [{transform_indices = @transform_0, window_bounds = array<i64: 1, 2048>}, {transform_indices = @transform_1, window_bounds = array<i64: 1, 2048>}]} {
    %c0 = arith.constant 0 : index
    %c0_0 = arith.constant 0 : index
    %0 = vector.load %arg1[%c0, %c0_0] : memref<1x2048xf32, #tpu.memory_space<vmem>>, vector<1x2048xf32>
    %c0_1 = arith.constant 0 : index
    %c0_2 = arith.constant 0 : index
    %1 = vector.load %arg2[%c0_1, %c0_2] : memref<1x2048xf32, #tpu.memory_space<vmem>>, vector<1x2048xf32>
    tpu.vector_store %arg2[%c0_1, %c0_2], %0 {strides = array<i32>} : memref<1x2048xf32, #tpu.memory_space<vmem>>, vector<1x2048xf32>,
    return
  }
  func.func @transform_0(%arg0: i32) -> (i32, i32) {
    %c0_i32 = arith.constant 0 : i32
    %c0_i32_0 = arith.constant 0 : i32
    return %arg0, %c0_i32 : i32, i32
  }
  func.func @transform_1(%arg0: i32) -> (i32, i32) {
    %c0_i32 = arith.constant 0 : i32
    %c0_i32_0 = arith.constant 0 : i32
    return %arg0, %c0_i32 : i32, i32
  }
}

</mosaic_0001>

<bundles_post_ra>
// kernel: tpu_custom_call.1
= control target key start
LH: loop header
LB: loop body
LE: loop exit
PB: predicated region body
PF: predicated region fallthrough
CT: control target
= control target key end

     0   :  { %6 = vsyncpa [#allocation3], 0  ;;  %s116_s0 = inlined_call_operand.hbm [shape: f32[1,2048], index: 0, kind: input, shape index: {}]   ;;  %s117_s1 = inlined_call_operand.hbm [shape: f32[1,2048], index: 1, kind: output, shape index: {}]  }
   0x1   :  { %7 = vsyncpa [#allocation4], 0  ;;  %s13_s8 = sshll.u32 %s116_s0, 4  ;;  %s98_s9 = smov [#allocation2]   ;;  %s14_s8 = int_to_ptr.hbm [resolvable:$true] %s13_s8 }
   0x2   :  { %s15_s10 = sshll.u32 %s98_s9, 4  ;;  %s16_s10 = int_to_ptr.vmem [resolvable:$true] %s15_s10 }
   0x3   :  { %18 = dma.hbm_to_vmem [thread:$0]  %s14_s8, 256, %s16_s10, [#allocation3]  }
   0x4   :  { %94 = dma.done.wait [#allocation3], 256  }
   0x5   :  { %95 = vsyncadd [#allocation3], 4294967040  ;;  %s99_s11 = smov [#allocation5]   ;;  %s34_s15 = sshll.u32 %s117_s1, 4  ;;  %v23_v0 = vld [vmem:[#allocation2] sm:$0xff]  ;;  %v24_v1 = vld [vmem:[#allocation2 + $0x8] sm:$0xff]  ;;  %s35_s15 = int_to_ptr.hbm [resolvable:$true] %s34_s15 }
   0x6   :  { %s32_s12 = sshll.u32 %s99_s11, 4  ;;  %25 = vst [vmem:[#allocation5] sm:$0xff] %v23_v0  ;;  %s33_s12 = int_to_ptr.vmem [resolvable:$true] %s32_s12 }
   0x7   :  { %26 = vst [vmem:[#allocation5 + $0x8] sm:$0xff] %v24_v1 }
   0x8   :  { %37 = dma.vmem_to_hbm [thread:$0]  %s33_s12, 256, %s35_s15, [#allocation4]  }
   0x9   :  { %96 = dma.done.wait [#allocation4], 256  }
   0xa   :  { %97 = vsyncadd [#allocation4], 4294967040 }
   0xb   :  { %42 = vsyncpa [#allocation3], 1 }
   0xc   :  { %43 = vsyncpa [#allocation4], 1 }

</bundles_post_ra>
